<compile_context>
chip_gen: v7x
topology: tpu7x:2x2x1
jax: 0.10.0
libtpu: 0.0.40
codegen_flags: <defaults>
</compile_context>

<pallas_src>
import jax
import jax.numpy as jnp
from jax.experimental import pallas as pl
from jax.experimental.pallas import tpu as pltpu


def _make_kernel(L, TL, inv_L):
    """Build the kernel body with static L / TL baked in via closure."""
    needs_mask = (L % TL) != 0

    def kernel(x_ref, w1t_ref, w2t_ref, o_ref, sum_ref, max_ref):
        l = pl.program_id(1)

        @pl.when(l == 0)
        def _init():
            sum_ref[...] = jnp.zeros_like(sum_ref)
            max_ref[...] = jnp.full_like(max_ref, -jnp.inf)

        x = x_ref[...].astype(jnp.float32)              # (TB, C, TL)
        if needs_mask:
            lane = jax.lax.broadcasted_iota(jnp.int32, (1, 1, TL), 2)
            valid = (l * TL + lane) < L                 # broadcasts over (TB, C)
            x_sum = jnp.where(valid, x, 0.0)
            x_max = jnp.where(valid, x, -jnp.inf)
        else:
            x_sum = x
            x_max = x

        # Lane (XLU) reduction per tile into tiny (TB, C) f32 accumulators.
        sum_ref[...] = sum_ref[...] + jnp.sum(x_sum, axis=-1)
        max_ref[...] = jnp.maximum(max_ref[...], jnp.max(x_max, axis=-1))

        @pl.when(l == pl.num_programs(1) - 1)
        def _finalize():
            mean = sum_ref[...] * inv_L                 # (TB, C)
            mx = max_ref[...]                           # (TB, C)
            pooled = jnp.concatenate([mean, mx], axis=0)  # (2*TB, C)

            w1t = w1t_ref[...].astype(jnp.float32)      # (C, C_r)
            w2t = w2t_ref[...].astype(jnp.float32)      # (C_r, C)

            # Fused FC over both pooling branches (one matmul pair, no .T).
            h = jnp.maximum(
                jnp.dot(pooled, w1t, preferred_element_type=jnp.float32), 0.0)
            y = jnp.dot(h, w2t, preferred_element_type=jnp.float32)  # (2*TB, C)

            tb = mean.shape[0]
            o_ref[...] = jax.nn.sigmoid(y[:tb] + y[tb:]).astype(o_ref.dtype)

    return kernel


def channel_attention(x, w1, w2, *, tl=None, vmem_budget_bytes=16 << 20):
    """x: (B, C, L); w1: (C_r, C); w2: (C, C_r). Returns (B, C, 1)."""
    B, C, L = x.shape
    C_r = w1.shape[0]
    assert w1.shape == (C_r, C) and w2.shape == (C, C_r)

    # --- B tile: leading block dim is unconstrained; keep it small so the
    #     "parallel" axis exists for megacore sharding when B is large.
    TB = B if B <= 8 else 8
    grid_b = pl.cdiv(B, TB)

    # --- L tile: lane-aligned (multiple of 128) unless L itself is the tile.
    #     VMEM per step is dominated by the double-buffered x tile (the two
    #     (TB, C) accumulators are negligible), so make TL as big as the
    #     budget allows.
    if tl is None:
        itemsize = jnp.dtype(x.dtype).itemsize
        per_lane_bytes = 2 * TB * C * itemsize          # 2x-buffered x tile
        tl = max(128, (vmem_budget_bytes // per_lane_bytes) // 128 * 128)
    if L <= tl:
        TL, grid_l = L, 1
    else:
        TL = max(128, (tl // 128) * 128)
        grid_l = pl.cdiv(L, TL)

    # Pre-transpose weights once in the wrapper (free layout plumbing) so the
    # kernel does no in-kernel transposes.
    w1t = jnp.transpose(w1)                             # (C, C_r)
    w2t = jnp.transpose(w2)                             # (C_r, C)

    kernel = _make_kernel(L, TL, 1.0 / L)

    itemsize = jnp.dtype(x.dtype).itemsize
    cost = pl.CostEstimate(
        flops=4 * B * C * L + 8 * B * C * C_r,
        transcendentals=2 * B * C,
        bytes_accessed=itemsize * B * C * L + 4 * (2 * C * C_r + B * C),
    )

    out = pl.pallas_call(
        kernel,
        out_shape=jax.ShapeDtypeStruct((B, C), x.dtype),
        grid=(grid_b, grid_l),
        in_specs=[
            pl.BlockSpec((TB, C, TL), lambda b, l: (b, 0, l)),
            pl.BlockSpec((C, C_r), lambda b, l: (0, 0)),   # resident weights
            pl.BlockSpec((C_r, C), lambda b, l: (0, 0)),   # resident weights
        ],
        out_specs=pl.BlockSpec((TB, C), lambda b, l: (b, 0)),
        scratch_shapes=[
            pltpu.VMEM((TB, C), jnp.float32),   # running sum
            pltpu.VMEM((TB, C), jnp.float32),   # running max
        ],
        compiler_params=pltpu.CompilerParams(
            dimension_semantics=("parallel", "arbitrary")),
        cost_estimate=cost,
    )(x, w1t, w2t)
    return out.reshape(B, C, 1)


def init_params(key, in_channels, reduction=16):
    """Deterministic kaiming_normal_ (fan_in, gain=sqrt(2)) init, bias=None."""
    c_r = in_channels // reduction
    k1, k2 = jax.random.split(key)
    std1 = (2.0 / in_channels) ** 0.5
    std2 = (2.0 / c_r) ** 0.5
    w1 = std1 * jax.random.normal(k1, (c_r, in_channels), dtype=jnp.float32)
    w2 = std2 * jax.random.normal(k2, (in_channels, c_r), dtype=jnp.float32)
    return w1, w2


if __name__ == "__main__":
    def reference(x, w1, w2):
        avg = jnp.mean(x, axis=-1)
        mx = jnp.max(x, axis=-1)
        fc = lambda v: jnp.maximum(v @ w1.T, 0.0) @ w2.T
        return jax.nn.sigmoid(fc(avg) + fc(mx))[..., None]

    # Small case matching the PyTorch module defaults (reduction=16 -> C_r=2).
    B, C, L = 2, 32, 16
    kx, kw = jax.random.split(jax.random.PRNGKey(0))
    x = jax.random.normal(kx, (B, C, L), dtype=jnp.float32)
    w1, w2 = init_params(kw, C, reduction=16)

    out = channel_attention(x, w1, w2)
    jax.block_until_ready(out)
    assert out.shape == (B, C, 1)
    assert jnp.allclose(out, reference(x, w1, w2), atol=1e-5, rtol=1e-5)

    # Exercise the multi-tile L grid + partial-tile masking path (L=320, TL=128).
    B2, C2, L2 = 2, 32, 320
    kx2, kw2 = jax.random.split(jax.random.PRNGKey(1))
    x2 = jax.random.normal(kx2, (B2, C2, L2), dtype=jnp.float32)
    w1b, w2b = init_params(kw2, C2, reduction=16)
    out2 = channel_attention(x2, w1b, w2b, tl=128)
    jax.block_until_ready(out2)
    assert jnp.allclose(out2, reference(x2, w1b, w2b), atol=1e-5, rtol=1e-5)

    print("KERNEL_OK")
</pallas_src>

<mosaic_0001>
module attributes {stable_mosaic.version = 11 : i64} {
  func.func @kernel(%arg0: i32, %arg1: i32, %arg2: memref<2x32x16xf32, #tpu.memory_space<vmem>>, %arg3: memref<32x2xf32, #tpu.memory_space<vmem>>, %arg4: memref<2x32xf32, #tpu.memory_space<vmem>>, %arg5: memref<2x32xf32, #tpu.memory_space<vmem>>, %arg6: memref<2x32xf32, #tpu.memory_space<vmem>>, %arg7: memref<2x32xf32, #tpu.memory_space<vmem>>) attributes {dimension_semantics = [#tpu.dimension_semantics<parallel>, #tpu.dimension_semantics<arbitrary>], iteration_bounds = array<i64: 1, 1>, scalar_prefetch = 0 : i64, scratch_operands = 2 : i64, tpu.core_type = #tpu.core_type<tc>, window_params = [{transform_indices = @transform_0, window_bounds = array<i64: 2, 32, 16>}, {pipeline_mode = #tpu.pipeline_mode<synchronous>, transform_indices = @transform_1, window_bounds = array<i64: 32, 2>}, {pipeline_mode = #tpu.pipeline_mode<synchronous>, transform_indices = @transform_2, window_bounds = array<i64: 2, 32>}, {transform_indices = @transform_3, window_bounds = array<i64: 2, 32>}]} {
    %c0_i32 = arith.constant 0 : i32
    %0 = arith.cmpi eq, %arg1, %c0_i32 : i32
    %1 = arith.extui %0 : i1 to i32
    %c0_i32_0 = arith.constant 0 : i32
    %2 = arith.cmpi ne, %1, %c0_i32_0 : i32
    scf.if %2 {
      %cst_14 = arith.constant 0.000000e+00 : f32
      %15 = vector.broadcast %cst_14 : f32 to vector<2x32xf32>
      %c0_15 = arith.constant 0 : index
      %c0_16 = arith.constant 0 : index
      %16 = vector.load %arg6[%c0_15, %c0_16] : memref<2x32xf32, #tpu.memory_space<vmem>>, vector<2x32xf32>
      tpu.vector_store %arg6[%c0_15, %c0_16], %15 {strides = array<i32>} : memref<2x32xf32, #tpu.memory_space<vmem>>, vector<2x32xf32>,
      %cst_17 = arith.constant 0xFF800000 : f32
      %17 = vector.broadcast %cst_17 : f32 to vector<2x32xf32>
      %c0_18 = arith.constant 0 : index
      %c0_19 = arith.constant 0 : index
      %18 = vector.load %arg7[%c0_18, %c0_19] : memref<2x32xf32, #tpu.memory_space<vmem>>, vector<2x32xf32>
      tpu.vector_store %arg7[%c0_18, %c0_19], %17 {strides = array<i32>} : memref<2x32xf32, #tpu.memory_space<vmem>>, vector<2x32xf32>,
    } else {
    }
    %c0 = arith.constant 0 : index
    %c0_1 = arith.constant 0 : index
    %c0_2 = arith.constant 0 : index
    %3 = vector.load %arg2[%c0, %c0_1, %c0_2] : memref<2x32x16xf32, #tpu.memory_space<vmem>>, vector<2x32x16xf32>
    %c0_3 = arith.constant 0 : index
    %c0_4 = arith.constant 0 : index
    %4 = vector.load %arg6[%c0_3, %c0_4] : memref<2x32xf32, #tpu.memory_space<vmem>>, vector<2x32xf32>
    %cst = arith.constant dense<0.000000e+00> : vector<2x32xf32>
    %5 = vector.multi_reduction <add>, %3, %cst [2] : vector<2x32x16xf32> to vector<2x32xf32>
    %6 = arith.addf %4, %5 : vector<2x32xf32>
    %c0_5 = arith.constant 0 : index
    %c0_6 = arith.constant 0 : index
    %7 = vector.load %arg6[%c0_5, %c0_6] : memref<2x32xf32, #tpu.memory_space<vmem>>, vector<2x32xf32>
    tpu.vector_store %arg6[%c0_5, %c0_6], %6 {strides = array<i32>} : memref<2x32xf32, #tpu.memory_space<vmem>>, vector<2x32xf32>,
    %c0_7 = arith.constant 0 : index
    %c0_8 = arith.constant 0 : index
    %8 = vector.load %arg7[%c0_7, %c0_8] : memref<2x32xf32, #tpu.memory_space<vmem>>, vector<2x32xf32>
    %cst_9 = arith.constant dense<0xFF800000> : vector<2x32xf32>
    %9 = vector.multi_reduction <maximumf>, %3, %cst_9 [2] : vector<2x32x16xf32> to vector<2x32xf32>
    %10 = arith.maximumf %8, %9 : vector<2x32xf32>
    %c0_10 = arith.constant 0 : index
    %c0_11 = arith.constant 0 : index
    %11 = vector.load %arg7[%c0_10, %c0_11] : memref<2x32xf32, #tpu.memory_space<vmem>>, vector<2x32xf32>
    tpu.vector_store %arg7[%c0_10, %c0_11], %10 {strides = array<i32>} : memref<2x32xf32, #tpu.memory_space<vmem>>, vector<2x32xf32>,
    %c0_i32_12 = arith.constant 0 : i32
    %12 = arith.cmpi eq, %arg1, %c0_i32_12 : i32
    %13 = arith.extui %12 : i1 to i32
    %c0_i32_13 = arith.constant 0 : i32
    %14 = arith.cmpi ne, %13, %c0_i32_13 : i32
    scf.if %14 {
      %c0_14 = arith.constant 0 : index
      %c0_15 = arith.constant 0 : index
      %15 = vector.load %arg6[%c0_14, %c0_15] : memref<2x32xf32, #tpu.memory_space<vmem>>, vector<2x32xf32>
      %cst_16 = arith.constant 6.250000e-02 : f32
      %16 = vector.broadcast %cst_16 : f32 to vector<2x32xf32>
      %17 = arith.mulf %15, %16 : vector<2x32xf32>
      %c0_17 = arith.constant 0 : index
      %c0_18 = arith.constant 0 : index
      %18 = vector.load %arg7[%c0_17, %c0_18] : memref<2x32xf32, #tpu.memory_space<vmem>>, vector<2x32xf32>
      %19 = tpu.concatenate %17, %18 in 0 : vector<2x32xf32>, vector<2x32xf32> -> vector<4x32xf32>
      %c0_19 = arith.constant 0 : index
      %c0_20 = arith.constant 0 : index
      %20 = vector.load %arg3[%c0_19, %c0_20] : memref<32x2xf32, #tpu.memory_space<vmem>>, vector<32x2xf32>
      %c0_21 = arith.constant 0 : index
      %c0_22 = arith.constant 0 : index
      %21 = vector.load %arg4[%c0_21, %c0_22] : memref<2x32xf32, #tpu.memory_space<vmem>>, vector<2x32xf32>
      %cst_23 = arith.constant dense<0.000000e+00> : vector<4x2xf32>
      %22 = tpu.matmul %19, %20, %cst_23 {dimension_numbers = #tpu.dot_dimension_numbers<[1], [0], [0], [1], [0, 0, 1, 1], [], []>} : vector<4x32xf32>, vector<32x2xf32>, vector<4x2xf32> -> vector<4x2xf32>
      %cst_24 = arith.constant 0.000000e+00 : f32
      %23 = vector.broadcast %cst_24 : f32 to vector<4x2xf32>
      %24 = arith.maximumf %22, %23 : vector<4x2xf32>
      %cst_25 = arith.constant dense<0.000000e+00> : vector<4x32xf32>
      %25 = tpu.matmul %24, %21, %cst_25 {dimension_numbers = #tpu.dot_dimension_numbers<[1], [0], [0], [1], [0, 0, 1, 1], [], []>} : vector<4x2xf32>, vector<2x32xf32>, vector<4x32xf32> -> vector<4x32xf32>
      %26 = vector.extract_strided_slice %25 {offsets = [0, 0], sizes = [2, 32], strides = [1, 1]} : vector<4x32xf32> to vector<2x32xf32>
      %27 = vector.extract_strided_slice %25 {offsets = [2, 0], sizes = [2, 32], strides = [1, 1]} : vector<4x32xf32> to vector<2x32xf32>
      %28 = arith.addf %26, %27 : vector<2x32xf32>
      %29 = arith.negf %28 : vector<2x32xf32>
      %30 = math.exp %29 : vector<2x32xf32>
      %cst_26 = arith.constant 1.000000e+00 : f32
      %31 = vector.broadcast %cst_26 : f32 to vector<2x32xf32>
      %32 = arith.addf %31, %30 : vector<2x32xf32>
      %33 = arith.divf %31, %32 : vector<2x32xf32>
      %c0_27 = arith.constant 0 : index
      %c0_28 = arith.constant 0 : index
      %34 = vector.load %arg5[%c0_27, %c0_28] : memref<2x32xf32, #tpu.memory_space<vmem>>, vector<2x32xf32>
      tpu.vector_store %arg5[%c0_27, %c0_28], %33 {strides = array<i32>} : memref<2x32xf32, #tpu.memory_space<vmem>>, vector<2x32xf32>,
    } else {
    }
    return
  }
  func.func @transform_0(%arg0: i32, %arg1: i32) -> (i32, i32, i32) {
    %c0_i32 = arith.constant 0 : i32
    %c0_i32_0 = arith.constant 0 : i32
    return %arg0, %c0_i32, %arg1 : i32, i32, i32
  }
  func.func @transform_1(%arg0: i32, %arg1: i32) -> (i32, i32) {
    %c0_i32 = arith.constant 0 : i32
    %c0_i32_0 = arith.constant 0 : i32
    %c0_i32_1 = arith.constant 0 : i32
    return %c0_i32, %c0_i32_0 : i32, i32
  }
  func.func @transform_2(%arg0: i32, %arg1: i32) -> (i32, i32) {
    %c0_i32 = arith.constant 0 : i32
    %c0_i32_0 = arith.constant 0 : i32
    %c0_i32_1 = arith.constant 0 : i32
    return %c0_i32, %c0_i32_0 : i32, i32
  }
  func.func @transform_3(%arg0: i32, %arg1: i32) -> (i32, i32) {
    %c0_i32 = arith.constant 0 : i32
    %c0_i32_0 = arith.constant 0 : i32
    return %arg0, %c0_i32 : i32, i32
  }
}

</mosaic_0001>

<bundles_post_ra>
// kernel: tpu_custom_call.1
= control target key start
LH: loop header
LB: loop body
LE: loop exit
PB: predicated region body
PF: predicated region fallthrough
CT: control target
= control target key end

     0   :  { %vm31_vm0 = vcmask 130048   ;;  %s561_s0 = inlined_call_operand.vmem [shape: f32[2,32,16], index: 0, kind: input, shape index: {}]   ;;  %s562_s1 = inlined_call_operand.vmem [shape: f32[32,2], index: 1, kind: input, shape index: {}]   ;;  %s563_s2 = inlined_call_operand.vmem [shape: f32[2,32], index: 2, kind: input, shape index: {}]   ;;  %s564_s3 = inlined_call_operand.hbm [shape: f32[2,32], index: 3, kind: output, shape index: {}]  }
   0x1   :  { %v26_v0 = vld [vmem:[%s561_s0 + $0x20] sm:$0xff]  ;;  %v27_v2 = vld [vmem:[%s561_s0 + $0x28] sm:$0xff] }
   0x2   :  { %v22_v1 = vld [vmem:[%s561_s0] sm:$0xff]  ;;  %v44_v3 = vsel %vm31_vm0, %v26_v0, 0.0  ;;  %v23_v5 = vld [vmem:[%s561_s0 + $0x8] sm:$0xff]  ;;  %v47_v6 = vsel %vm31_vm0, %v27_v2, 0.0 }
   0x3   :  { %v32_v4 = vsel %vm31_vm0, %v22_v1, 0.0  ;;  %45 = vadd.xlane.f32.xlu1 %v44_v3  ;;  %v35_v7 = vsel %vm31_vm0, %v23_v5, 0.0 }
   0x4   :  { %33 = vadd.xlane.f32.xlu0 %v32_v4 }
   0x5   :  { %8 = vsyncpa [#allocation5], 0  ;;  %v120_v8 = vsel %vm31_vm0, %v23_v5, -inf  ;;  %v117_v9 = vsel %vm31_vm0, %v22_v1, -inf  ;;  %v132_v10 = vsel %vm31_vm0, %v27_v2, -inf  ;;  %v129_v11 = vsel %vm31_vm0, %v26_v0, -inf }
   0x6   :  { %v28_v12 = vld [vmem:[%s561_s0 + $0x30] sm:$0xff]  ;;  %v29_v18 = vld [vmem:[%s561_s0 + $0x38] sm:$0xff]  ;;  %vm19_vm1 = vcmask 254976   ;;  %v450_v24 = vmov 0.0   ;;  %v451_v25 = vmov -inf   ;;  %v202_v26 = vld [vmem:[%s562_s1] sm:$0xff]  ;;  %v64_v37 = vlaneseq }
   0x7   :  { %48 = vadd.xlane.f32.xlu1 %v47_v6  ;;  %v24_v13 = vld [vmem:[%s561_s0 + $0x10] sm:$0xff]  ;;  %v50_v14 = vsel %vm31_vm0, %v28_v12, 0.0  ;;  %v135_v16 = vsel %vm31_vm0, %v28_v12, -inf  ;;  %v25_v19 = vld [vmem:[%s561_s0 + $0x18] sm:$0xff]  ;;  %v53_v20 = vsel %vm31_vm0, %v29_v18, 0.0  ;;  %v138_v22 = vsel %vm31_vm0, %v29_v18, -inf  ;;  %406 = vmatprep.subr.mxu1 %v450_v24 }
   0x8   :  { %36 = vadd.xlane.f32.xlu0 %v35_v7  ;;  %v38_v15 = vsel %vm31_vm0, %v24_v13, 0.0  ;;  %v123_v17 = vsel %vm31_vm0, %v24_v13, -inf  ;;  %v41_v21 = vsel %vm31_vm0, %v25_v19, 0.0  ;;  %v126_v23 = vsel %vm31_vm0, %v25_v19, -inf  ;;  %20 = vst.msk [vmem:[#allocation2] sm:$0x3] %vm19_vm1, %v450_v24 }
   0x9   :  { %21 = vst.msk [vmem:[#allocation3] sm:$0x3] %vm19_vm1, %v451_v25  ;;  %v203_v27 = vld [vmem:[%s562_s1 + $0x8] sm:$0xff]  ;;  %v204_v28 = vld [vmem:[%s562_s1 + $0x10] sm:$0xff]  ;;  %v452_v29 = vmov 0.0|0.0   ;;  %v205_v31 = vld [vmem:[%s562_s1 + $0x18] sm:$0xff] }
   0xa   :  { %411 = vmatprep.subr.bf16.mxu0 %v452_v29  ;;  %v412_v30 = vpack.c.bf16 %v203_v27, %v202_v26  ;;  %vm453_vm2 = vmmov 0   ;;  %v415_v32 = vpack.c.bf16 %v205_v31, %v204_v28  ;;  %v65_v40 = vand.u32 127, %v64_v37  ;;  %s454_s9 = smov [#allocation4]  }
   0xb   :  { %121 = vmax.xlane.f32.xlu1 %v120_v8  ;;  %403 = vmatprep.mubr.msk.f32.mxu0 %vm453_vm2, %v450_v24  ;;  %v67_v44 = vshrl.u32 %v64_v37, 7  ;;  %vm75_vm3 = vcmask 130112   ;;  %vm82_vm4 = vcmask 195712   ;;  %vm89_vm5 = vcmask 261312   ;;  %s376_s10 = sshll.u32 %s454_s9, 4  ;;  %s377_s10 = int_to_ptr.vmem [resolvable:$true] %s376_s10 }
   0xc   :  { %118 = vmax.xlane.f32.xlu0 %v117_v9  ;;  %408 = vmatprep.mubr.msk.f32.mxu1 %vm453_vm2, %v450_v24  ;;  %v70_v41 = vadd.s32 4294967288, %v65_v40  ;;  %v77_v45 = vadd.s32 4294967280, %v65_v40  ;;  %v84_v49 = vadd.s32 4294967272, %v65_v40  ;;  %vm110_vm6 = vcmask 1041409   ;;  %p431_p1 = scmp.lt.s32.totalorder %s377_s10, %s377_s10 }
   0xd   :  { %413 = vmatpush3.bf16.msra.mxu0 %v412_v30  ;;  %v68_v50 = vsub.s32 %v65_v40, %v67_v44  ;;  %vm200_vm7 = vcmask 1041408   ;;  %vm207_vm8 = vcmask 261120   ;;  %vm282_vm9 = vcmask 15360  }
   0xe   :  { %414 = vmatprep.subr.bf16.mxu0 %v452_v29  ;;  %v73_v46 = vsub.s32 %v70_v41, %v67_v44  ;;  %v80_v51 = vsub.s32 %v77_v45, %v67_v44  ;;  %v87_v56 = vsub.s32 %v84_v49, %v67_v44 }
   0xf   :  { %133 = vmax.xlane.f32.xlu1 %v132_v10 }
  0x10   :  { %130 = vmax.xlane.f32.xlu0 %v129_v11  ;;  %v30_v11 = vld [vmem:[#allocation2] sm:$0x3]  ;;  %v116_v24 = vld [vmem:[#allocation3] sm:$0x3] }
  0x11   :  { %416 = vmatpush3.bf16.msra.mxu0 %v415_v32 }
  0x13   :  { %51 = vadd.xlane.f32.xlu1 %v50_v14 }
  0x14   :  { %39 = vadd.xlane.f32.xlu0 %v38_v15 }
  0x17   :  { %136 = vmax.xlane.f32.xlu1 %v135_v16 }
  0x18   :  { %124 = vmax.xlane.f32.xlu0 %v123_v17 }
  0x1b   :  { %54 = vadd.xlane.f32.xlu1 %v53_v20 }
  0x1c   :  { %42 = vadd.xlane.f32.xlu0 %v41_v21 }
  0x1f   :  { %139 = vmax.xlane.f32.xlu1 %v138_v22 }
  0x20   :  { %127 = vmax.xlane.f32.xlu0 %v126_v23 }
  0x90   :  { %v46_v33 = vpop.xlane.xlu1 %45 }
  0x91   :  { %v34_v34 = vpop.xlane.xlu0 %33  ;;  %v94_v57 = vrot.slane %v46_v33, %v68_v50 }
  0x92   :  { %v69_v58 = vrot.slane %v34_v34, %v68_v50  ;;  %v206_v34 = vld [vmem:[%s563_s2] sm:$0x3]  ;;  %s426_s2 = scalar_lea.vmem %s377_s10, 32 }
  0x93   :  { %407 = vmatpush3.msk.msra.mxu1 %vm200_vm7, %v206_v34  ;;  %p427_p0 = scmp.ne.s32.totalorder %s377_s10, %s426_s2  ;;  %p432_p2 = scmp.lt.s32.totalorder %s426_s2, %s426_s2 }
  0x94   :  { %v49_v35 = vpop.xlane.xlu1 %48 }
  0x95   :  { %v37_v36 = vpop.xlane.xlu0 %36  ;;  %v98_v52 = vrot.slane %v49_v35, %v73_v46  ;;  %p433_p3 = por %p432_p2, %p431_p1 }
  0x96   :  { %v74_v53 = vrot.slane %v37_v36, %v73_v46 }
  0x97   :  { %v99_v61 = vsel %vm75_vm3, %v98_v52, %v94_v57  ;;  %p434_p4 = pnand %p433_p3, %p427_p0 }
  0x98   :  { %v122_v38 = vpop.xlane.xlu1 %121  ;;  %v76_v62 = vsel %vm75_vm3, %v74_v53, %v69_v58 }
  0x99   :  { %v119_v39 = vpop.xlane.xlu0 %118  ;;  %v156_v63 = vrot.slane %v122_v38, %v73_v46 }
  0x9a   :  { %v152_v0 = vrot.slane %v119_v39, %v68_v50 }
  0x9c   :  { %v134_v42 = vpop.xlane.xlu1 %133  ;;  %v157_v14 = vsel %vm75_vm3, %v156_v63, %v152_v0 }
  0x9d   :  { %v131_v43 = vpop.xlane.xlu0 %130  ;;  %v175_v3 = vrot.slane %v134_v42, %v73_v46 }
  0x9e   :  { %v171_v4 = vrot.slane %v131_v43, %v68_v50 }
  0xa0   :  { %v52_v47 = vpop.xlane.xlu1 %51  ;;  %v176_v18 = vsel %vm75_vm3, %v175_v3, %v171_v4 }
  0xa1   :  { %v40_v48 = vpop.xlane.xlu0 %39  ;;  %v103_v59 = vrot.slane %v52_v47, %v80_v51 }
  0xa2   :  { %v81_v60 = vrot.slane %v40_v48, %v80_v51 }
  0xa3   :  { %v104_v7 = vsel %vm82_vm4, %v103_v59, %v99_v61 }
  0xa4   :  { %v137_v54 = vpop.xlane.xlu1 %136  ;;  %v83_v8 = vsel %vm82_vm4, %v81_v60, %v76_v62 }
  0xa5   :  { %v125_v55 = vpop.xlane.xlu0 %124  ;;  %v180_v9 = vrot.slane %v137_v54, %v80_v51 }
  0xa6   :  { %v161_v10 = vrot.slane %v125_v55, %v80_v51 }
  0xa7   :  { %v181_v22 = vsel %vm82_vm4, %v180_v9, %v176_v18 }
  0xa8   :  { %v55_v1 = vpop.xlane.xlu1 %54  ;;  %v162_v23 = vsel %vm82_vm4, %v161_v10, %v157_v14 }
  0xa9   :  { %v43_v2 = vpop.xlane.xlu0 %42  ;;  %v108_v5 = vrot.slane %v55_v1, %v87_v56 }
  0xaa   :  { %v88_v6 = vrot.slane %v43_v2, %v87_v56 }
  0xab   :  { %v109_v12 = vsel %vm89_vm5, %v108_v5, %v104_v7 }
  0xac   :  { %v90_v13 = vsel %vm89_vm5, %v88_v6, %v83_v8  ;;  %v140_v16 = vpop.xlane.xlu1 %139 }
  0xad   :  { %v111_v15 = vsel %vm110_vm6, %v109_v12, %v90_v13  ;;  %v128_v17 = vpop.xlane.xlu0 %127  ;;  %v185_v19 = vrot.slane %v140_v16, %v87_v56 }
  0xae   :  { %v166_v20 = vrot.slane %v128_v17, %v87_v56  ;;  %v113_v21 = vadd.f32 %v111_v15, %v30_v11 }
  0xaf   :  { %v186_v25 = vsel %vm89_vm5, %v185_v19, %v181_v22 }
  0xb0   :  { %v167_v26 = vsel %vm89_vm5, %v166_v20, %v162_v23  ;;  %115 = vst.msk [vmem:[#allocation2] sm:$0x3] %vm19_vm1, %v113_v21 }
  0xb1   :  { %v187_v27 = vsel %vm110_vm6, %v186_v25, %v167_v26 }
  0xb2   :  { %v189_v28 = vmax.f32 %v116_v24, %v187_v27 }
  0xb4   :  { %190 = vst.msk [vmem:[#allocation3] sm:$0x3] %vm19_vm1, %v189_v28 }
  0xb7   :  { %v194_v29 = vld [vmem:[#allocation2] sm:$0x3] }
  0xb8   :  { %v195_v31 = vmul.f32 0.0625, %v194_v29 }
  0xbb   :  { %v196_v30 = vld [vmem:[#allocation3] sm:$0x3] }
  0xbc   :  { %v198_v32 = vrot.slane %v196_v30, 6 }
  0xbe   :  { %v201_v33 = vsel %vm200_vm7, %v195_v31, %v198_v32 }
  0xbf   :  { %404 = vmatmul.mubr.msk.f32.vlgmr.msra.gmra.mrb[0].mxu0 %vm207_vm8, %v201_v33 }
 0x192   :  { %v277_v35 = vpop.f32.mrb[0].mxu0 }
 0x193   :  { %v281_v36 = vmax.f32 %v277_v35, 0.0  ;;  %v405_v37 = vpop.f32.mrb[1].mxu0 }
 0x195   :  { %409 = vmatmul.mubr.msk.f32.vlgmr.msra.gmra.mrb[0].mxu1 %vm282_vm9, %v281_v36 }
 0x268   :  { %v355_v38 = vpop.f32.mrb[0].mxu1 }
 0x269   :  { %v360_v39 = vrot.slane %v355_v38, 2  ;;  %v410_v40 = vpop.f32.mrb[1].mxu1 }
 0x26b   :  { %v362_v41 = vadd.f32 %v360_v39, %v355_v38 }
 0x26d   :  { %v387_v42 = vmul.f32 -1.442695, %v362_v41 }
 0x26f   :  { %422 = vpow2.f32 %v387_v42 }
 0x279   :  { %v423_v43 = vpop.eup %422 }
 0x27a   :  { %v366_v44 = vadd.f32 1.0, %v423_v43 }
 0x27c   :  { %424 = vrcp.f32 %v366_v44 }
 0x286   :  { %v425_v45 = vpop.eup %424 }
 0x287   :  { %369 = vst.msk [vmem:[#allocation4] sm:$0x3] %vm19_vm1, %v425_v45 }
 0x288   :  { %437 = shalt.err (!%p434_p4)
}
 0x289   :  { %s438_s13 = scalar_lea.hbm %s564_s3, 32 }
 0x28a   :  { %p439_p5 = scmp.ne.s32.totalorder %s564_s3, %s438_s13  ;;  %p442_p6 = scmp.lt.u32.totalorder %s438_s13, %s564_s3 }
 0x28c   :  { %p444_p7 = pnand %p442_p6, %p439_p5 }
 0x28e   :  { %447 = shalt.err (!%p444_p7)
}
 0x28f   :  { %379 = dma.vmem_to_hbm [thread:$0]  %s377_s10, 32, %s564_s3, [#allocation5]  }
 0x290   :  { %448 = dma.done.wait [#allocation5], 32  }
 0x291   :  { %449 = vsyncadd [#allocation5], 4294967264 }
 0x292   :  { %383 = vsyncpa [#allocation5], 1 }

</bundles_post_ra>
